<compile_context>
chip_gen: v6e
topology: v6e:2x2x1
jax: 0.10.0
libtpu: 0.0.40
codegen_flags: <defaults>
</compile_context>

<pallas_src>
import math

import jax
import jax.numpy as jnp
from jax import lax
from jax.experimental import pallas as pl
from jax.experimental.pallas import tpu as pltpu


# ----------------------------- in-kernel helpers -----------------------------
def _layernorm(x, w, b, eps=1e-5):
    mean = jnp.mean(x, axis=-1, keepdims=True)
    var = jnp.mean((x - mean) ** 2, axis=-1, keepdims=True)
    return (x - mean) * lax.rsqrt(var + eps) * w + b


def _softmax_rows(s):
    m = jnp.max(s, axis=-1, keepdims=True)
    e = jnp.exp(s - m)
    # divide -> EUP approx reciprocal (frees VALU issue slots)
    return e * pl.reciprocal(jnp.sum(e, axis=-1, keepdims=True), approx=True)


def _gelu_exact(x):
    # torch.nn.GELU() default = exact erf formulation
    return 0.5 * x * (1.0 + lax.erf(x * 0.7071067811865476))


def _mlp_tail(out1, ln2w, ln2b, m1w, m1b, m2w, m2b):
    # out1 is f32 (B*N, D); matmul operands bf16, accumulation f32.
    on2 = _layernorm(out1, ln2w[...], ln2b[...]).astype(jnp.bfloat16)
    h1 = jnp.dot(on2, m1w[...], preferred_element_type=jnp.float32) + m1b[...]
    g = _gelu_exact(h1).astype(jnp.bfloat16)
    h2 = jnp.dot(g, m2w[...], preferred_element_type=jnp.float32) + m2b[...]
    return out1 + h2


_COMPILER_PARAMS = pltpu.CompilerParams(vmem_limit_bytes=32 * 1024 * 1024)


# ------------------------- Block (tensor path: MSA) --------------------------
def block_forward_msa(x, kp, n_heads):
    B, N, D = x.shape
    H = n_heads
    dh = D // H
    BN = B * N

    def kernel(x_ref, ln1w, ln1b, wqkv, bqkv, ln2w, ln2b, m1w, m1b, m2w, m2b,
               o_ref):
        x2 = x_ref[...]                                            # (BN, D) f32
        xn = _layernorm(x2, ln1w[...], ln1b[...])
        # One fused QKV launch: block-diagonal (D, 3D) weight, head-major
        # [q_h | k_h | v_h] columns, 1/sqrt(dh) already folded into Q.
        qkv = jnp.dot(xn.astype(jnp.bfloat16), wqkv[...],
                      preferred_element_type=jnp.float32) + bqkv[...]   # (BN, 3D)
        # Recover true per-head tiles: lane slices (head-major) + leading-dim
        # reshape (B*N -> B, N folds into the (head, batch) group axis).
        qkv_h = jnp.stack(
            [qkv[:, 3 * dh * h:3 * dh * (h + 1)] for h in range(H)], axis=0)
        qkv_g = qkv_h.reshape(H * B, N, 3 * dh).astype(jnp.bfloat16)
        q = qkv_g[..., 0:dh]
        k = qkv_g[..., dh:2 * dh]
        v = qkv_g[..., 2 * dh:3 * dh]
        # NOTE: Mosaic handles the NT contraction here; at production consider
        # emitting K pre-transposed ((g, dh, N)) to keep the XLU free.
        s = jnp.einsum('gnd,gmd->gnm', q, k,
                       preferred_element_type=jnp.float32)         # (H*B, N, N)
        attn = _softmax_rows(s).astype(jnp.bfloat16)
        hv = jnp.einsum('gnm,gmd->gnd', attn, v,
                        preferred_element_type=jnp.float32)        # (H*B, N, dh)
        hv = hv.reshape(H, BN, dh)
        msa = jnp.concatenate([hv[h] for h in range(H)], axis=-1)  # (BN, D) = hstack
        out1 = x2 + msa
        o_ref[...] = _mlp_tail(out1, ln2w, ln2b, m1w, m1b, m2w,
                               m2b).astype(o_ref.dtype)

    out = pl.pallas_call(
        kernel,
        out_shape=jax.ShapeDtypeStruct((BN, D), x.dtype),
        compiler_params=_COMPILER_PARAMS,
    )(x.reshape(BN, D), kp["ln1w"], kp["ln1b"], kp["wqkv"], kp["bqkv"],
      kp["ln2w"], kp["ln2b"], kp["m1w"], kp["m1b"], kp["m2w"], kp["m2b"])
    return out.reshape(B, N, D)


# ------------------------ Block (list path: AugHead) -------------------------
def block_forward_aht(x0, x1, kp):
    B, N, D = x0.shape
    BN = B * N

    def kernel(x0_ref, x1_ref, ln1w, ln1b, awqkv, abqkv, ab,
               ln2w, ln2b, m1w, m1b, m2w, m2b, o_ref):
        xa = x0_ref[...]                                            # (BN, D) f32
        xb = x1_ref[...]
        xn0 = _layernorm(xa, ln1w[...], ln1b[...])
        xn1 = _layernorm(xb, ln1w[...], ln1b[...])
        xs = jnp.stack([xn0, xn1], axis=0).astype(jnp.bfloat16)     # (2, BN, D)
        # One fused per-aug-head QKV launch; output projection aw already folded
        # into the V columns/bias at pack time.
        qkv = jnp.einsum('hnd,hde->hne', xs, awqkv[...],
                         preferred_element_type=jnp.float32) + abqkv[...]  # (2,BN,3D)
        qkv_g = qkv.reshape(2 * B, N, 3 * D).astype(jnp.bfloat16)   # (2B, N, 3D)
        q = qkv_g[..., 0:D]
        k = qkv_g[..., D:2 * D]
        v = qkv_g[..., 2 * D:3 * D]
        s = jnp.einsum('gnd,gmd->gnm', q, k,
                       preferred_element_type=jnp.float32)          # (2B, N, N)
        attn = _softmax_rows(s).astype(jnp.bfloat16)
        ov = jnp.einsum('gnm,gmd->gnd', attn, v,
                        preferred_element_type=jnp.float32)         # (2B, N, D)
        ovh = ov.reshape(2, BN, D)
        aht = ovh[0] + ovh[1] + ab[...]       # head-sum == hstack@aw (folded)
        out1 = xa + aht                       # residual uses x[0]
        o_ref[...] = _mlp_tail(out1, ln2w, ln2b, m1w, m1b, m2w,
                               m2b).astype(o_ref.dtype)

    out = pl.pallas_call(
        kernel,
        out_shape=jax.ShapeDtypeStruct((BN, D), x0.dtype),
        compiler_params=_COMPILER_PARAMS,
    )(x0.reshape(BN, D), x1.reshape(BN, D),
      kp["ln1w"], kp["ln1b"], kp["awqkv"], kp["abqkv"], kp["ab"],
      kp["ln2w"], kp["ln2b"], kp["m1w"], kp["m1b"], kp["m2w"], kp["m2b"])
    return out.reshape(B, N, D)


# ---------------------- parameter packing (wrapper-time) ---------------------
def pack_kernel_params(p, hidden_dim, n_heads):
    """Pack logical (torch-equivalent) f32 params into kernel-friendly layouts."""
    D, H = hidden_dim, n_heads
    dh = D // H
    bf16 = jnp.bfloat16
    s_msa = 1.0 / math.sqrt(dh)
    s_aht = 1.0 / math.sqrt(D)

    # MSA fused QKV: block-diagonal on the input (rows h*dh:(h+1)*dh), head-major
    # [q_h | k_h | v_h] columns; 1/sqrt(dh) folded into Q.
    rows = []
    for h in range(H):
        blk = jnp.concatenate(
            [p["qw"][h] * s_msa, p["kw"][h], p["vw"][h]], axis=1)     # (dh, 3dh)
        rows.append(jnp.pad(blk, ((0, 0), (3 * dh * h, 3 * dh * (H - 1 - h)))))
    wqkv = jnp.concatenate(rows, axis=0)                              # (D, 3D)
    bqkv = jnp.concatenate(
        [jnp.concatenate([p["qb"][h] * s_msa, p["kb"][h], p["vb"][h]], axis=1)
         for h in range(H)], axis=1)                                  # (1, 3D)

    # AugHead fused QKV (2 heads, D->D), output projection folded into V exactly:
    # (attn @ (xn@avw + avb)) @ aw_h == attn @ (xn @ (avw@aw_h) + avb@aw_h).
    aw_h = jnp.stack([p["aw"][:D], p["aw"][D:]], axis=0)              # (2, D, D)
    avw_f = jnp.einsum('hij,hjk->hik', p["avw"], aw_h)                # (2, D, D)
    avb_f = jnp.einsum('hij,hjk->hik', p["avb"], aw_h)                # (2, 1, D)
    awqkv = jnp.concatenate([p["aqw"] * s_aht, p["akw"], avw_f], axis=-1)  # (2,D,3D)
    abqkv = jnp.concatenate([p["aqb"] * s_aht, p["akb"], avb_f], axis=-1)  # (2,1,3D)

    return {
        "ln1w": p["ln1w"], "ln1b": p["ln1b"],
        "ln2w": p["ln2w"], "ln2b": p["ln2b"],
        "wqkv": wqkv.astype(bf16), "bqkv": bqkv,
        "awqkv": awqkv.astype(bf16), "abqkv": abqkv,
        "ab": p["ab"],
        "m1w": p["m1w"].astype(bf16), "m1b": p["m1b"],
        "m2w": p["m2w"].astype(bf16), "m2b": p["m2b"],
    }


# ----------------------------- pure-JAX reference ----------------------------
def _ref_ln(x, w, b, eps=1e-5):
    m = x.mean(-1, keepdims=True)
    v = ((x - m) ** 2).mean(-1, keepdims=True)
    return (x - m) / jnp.sqrt(v + eps) * w[0] + b[0]


def _ref_mlp_tail(out1, p):
    on2 = _ref_ln(out1, p["ln2w"], p["ln2b"])
    h1 = on2 @ p["m1w"] + p["m1b"][0]
    g = 0.5 * h1 * (1.0 + lax.erf(h1 * 0.7071067811865476))
    return out1 + g @ p["m2w"] + p["m2b"][0]


def ref_block_msa(x, p, n_heads):
    D = x.shape[-1]
    dh = D // n_heads
    xn = _ref_ln(x, p["ln1w"], p["ln1b"])
    outs = []
    for h in range(n_heads):
        sh = xn[..., h * dh:(h + 1) * dh]
        q = sh @ p["qw"][h] + p["qb"][h][0]
        k = sh @ p["kw"][h] + p["kb"][h][0]
        v = sh @ p["vw"][h] + p["vb"][h][0]
        a = jax.nn.softmax(
            jnp.einsum("bnd,bmd->bnm", q, k) / math.sqrt(dh), axis=-1)
        outs.append(jnp.einsum("bnm,bmd->bnd", a, v))
    out1 = x + jnp.concatenate(outs, -1)
    return _ref_mlp_tail(out1, p)


def ref_block_aht(x0, x1, p):
    D = x0.shape[-1]
    xn = [_ref_ln(x0, p["ln1w"], p["ln1b"]), _ref_ln(x1, p["ln1w"], p["ln1b"])]
    outs = []
    for h in range(2):
        q = xn[h] @ p["aqw"][h] + p["aqb"][h][0]
        k = xn[h] @ p["akw"][h] + p["akb"][h][0]
        v = xn[h] @ p["avw"][h] + p["avb"][h][0]
        a = jax.nn.softmax(
            jnp.einsum("bnd,bmd->bnm", q, k) / math.sqrt(D), axis=-1)
        outs.append(jnp.einsum("bnm,bmd->bnd", a, v))
    aht = jnp.concatenate(outs, -1) @ p["aw"] + p["ab"][0]
    out1 = x0 + aht
    return _ref_mlp_tail(out1, p)


# ------------------------------------ main ------------------------------------
def init_params(key, hidden_dim, n_heads, mlp_ratio=4):
    dh = hidden_dim // n_heads
    ks = jax.random.split(key, 16)
    n = lambda k, s, scale: (scale * jax.random.normal(k, s)).astype(jnp.float32)
    return {
        # LayerNorms (torch default affine: weight=1, bias=0)
        "ln1w": jnp.ones((1, hidden_dim), jnp.float32),
        "ln1b": jnp.zeros((1, hidden_dim), jnp.float32),
        "ln2w": jnp.ones((1, hidden_dim), jnp.float32),
        "ln2b": jnp.zeros((1, hidden_dim), jnp.float32),
        # MultiHeadAttention per-head linears (dh -> dh), weights (in, out)
        "qw": n(ks[0], (n_heads, dh, dh), 0.2), "qb": n(ks[1], (n_heads, 1, dh), 0.1),
        "kw": n(ks[2], (n_heads, dh, dh), 0.2), "kb": n(ks[3], (n_heads, 1, dh), 0.1),
        "vw": n(ks[4], (n_heads, dh, dh), 0.2), "vb": n(ks[5], (n_heads, 1, dh), 0.1),
        # AugHeadAttention: 2 heads, full-dim linears (D -> D)
        "aqw": n(ks[6], (2, hidden_dim, hidden_dim), 0.1),
        "aqb": n(ks[7], (2, 1, hidden_dim), 0.1),
        "akw": n(ks[8], (2, hidden_dim, hidden_dim), 0.1),
        "akb": n(ks[9], (2, 1, hidden_dim), 0.1),
        "avw": n(ks[10], (2, hidden_dim, hidden_dim), 0.1),
        "avb": n(ks[11], (2, 1, hidden_dim), 0.1),
        # AugHead output mlp: Linear(2D -> D)
        "aw": n(ks[12], (2 * hidden_dim, hidden_dim), 0.1),
        "ab": n(ks[13], (1, hidden_dim), 0.1),
        # Block MLP: Linear(D -> 4D), GELU, Linear(4D -> D)
        "m1w": n(ks[14], (hidden_dim, mlp_ratio * hidden_dim), 0.1),
        "m1b": jnp.zeros((1, mlp_ratio * hidden_dim), jnp.float32),
        "m2w": n(ks[15], (mlp_ratio * hidden_dim, hidden_dim), 0.05),
        "m2b": jnp.zeros((1, hidden_dim), jnp.float32),
    }


if __name__ == "__main__":
    B, N, D, H = 2, 8, 32, 4   # batch, seq, hidden_dim, n_heads
    key = jax.random.PRNGKey(0)
    kx0, kx1, kpk = jax.random.split(key, 3)
    x0 = jax.random.normal(kx0, (B, N, D), jnp.float32)
    x1 = jax.random.normal(kx1, (B, N, D), jnp.float32)
    params = init_params(kpk, D, H)
    kparams = pack_kernel_params(params, D, H)

    # Tensor path: out = x + MSA(LN(x)); out = out + MLP(LN(out))
    y_msa = jax.block_until_ready(block_forward_msa(x0, kparams, H))
    y_msa_ref = ref_block_msa(x0, params, H)
    assert jnp.allclose(y_msa, y_msa_ref, atol=5e-2, rtol=5e-2), "MSA path mismatch"

    # List path: out = x[0] + AHT([LN(x[0]), LN(x[1])]); out = out + MLP(LN(out))
    y_aht = jax.block_until_ready(block_forward_aht(x0, x1, kparams))
    y_aht_ref = ref_block_aht(x0, x1, params)
    assert jnp.allclose(y_aht, y_aht_ref, atol=5e-2, rtol=5e-2), "AHT path mismatch"

    print("KERNEL_OK")
</pallas_src>

<mosaic_0001>
module attributes {stable_mosaic.version = 11 : i64} {
  func.func @kernel(%arg0: memref<16x32xf32, #tpu.memory_space<vmem>>, %arg1: memref<1x32xf32, #tpu.memory_space<vmem>>, %arg2: memref<1x32xf32, #tpu.memory_space<vmem>>, %arg3: memref<32x96xbf16, #tpu.memory_space<vmem>>, %arg4: memref<1x96xf32, #tpu.memory_space<vmem>>, %arg5: memref<1x32xf32, #tpu.memory_space<vmem>>, %arg6: memref<1x32xf32, #tpu.memory_space<vmem>>, %arg7: memref<32x128xbf16, #tpu.memory_space<vmem>>, %arg8: memref<1x128xf32, #tpu.memory_space<vmem>>, %arg9: memref<128x32xbf16, #tpu.memory_space<vmem>>, %arg10: memref<1x32xf32, #tpu.memory_space<vmem>>, %arg11: memref<16x32xf32, #tpu.memory_space<vmem>>) attributes {dimension_semantics = [], scalar_prefetch = 0 : i64, scratch_operands = 0 : i64, tpu.core_type = #tpu.core_type<tc>} {
    %c0 = arith.constant 0 : index
    %c0_0 = arith.constant 0 : index
    %0 = vector.load %arg0[%c0, %c0_0] : memref<16x32xf32, #tpu.memory_space<vmem>>, vector<16x32xf32>
    %c0_1 = arith.constant 0 : index
    %c0_2 = arith.constant 0 : index
    %1 = vector.load %arg1[%c0_1, %c0_2] : memref<1x32xf32, #tpu.memory_space<vmem>>, vector<1x32xf32>
    %c0_3 = arith.constant 0 : index
    %c0_4 = arith.constant 0 : index
    %2 = vector.load %arg2[%c0_3, %c0_4] : memref<1x32xf32, #tpu.memory_space<vmem>>, vector<1x32xf32>
    %cst = arith.constant dense<0.000000e+00> : vector<16xf32>
    %3 = vector.multi_reduction <add>, %0, %cst [1] : vector<16x32xf32> to vector<16xf32>
    %4 = vector.shape_cast %3 : vector<16xf32> to vector<16x1xf32>
    %cst_5 = arith.constant 3.200000e+01 : f32
    %5 = vector.broadcast %cst_5 : f32 to vector<16x1xf32>
    %6 = arith.divf %4, %5 : vector<16x1xf32>
    %7 = vector.broadcast %6 : vector<16x1xf32> to vector<16x32xf32>
    %8 = arith.subf %0, %7 : vector<16x32xf32>
    %9 = arith.mulf %8, %8 : vector<16x32xf32>
    %cst_6 = arith.constant dense<0.000000e+00> : vector<16xf32>
    %10 = vector.multi_reduction <add>, %9, %cst_6 [1] : vector<16x32xf32> to vector<16xf32>
    %11 = vector.shape_cast %10 : vector<16xf32> to vector<16x1xf32>
    %cst_7 = arith.constant 3.200000e+01 : f32
    %12 = vector.broadcast %cst_7 : f32 to vector<16x1xf32>
    %13 = arith.divf %11, %12 : vector<16x1xf32>
    %14 = vector.broadcast %6 : vector<16x1xf32> to vector<16x32xf32>
    %15 = arith.subf %0, %14 : vector<16x32xf32>
    %cst_8 = arith.constant 9.99999974E-6 : f32
    %16 = vector.broadcast %cst_8 : f32 to vector<16x1xf32>
    %17 = arith.addf %13, %16 : vector<16x1xf32>
    %18 = math.rsqrt %17 : vector<16x1xf32>
    %19 = vector.broadcast %18 : vector<16x1xf32> to vector<16x32xf32>
    %20 = arith.mulf %15, %19 : vector<16x32xf32>
    %21 = vector.broadcast %1 : vector<1x32xf32> to vector<16x32xf32>
    %22 = arith.mulf %20, %21 : vector<16x32xf32>
    %23 = vector.broadcast %2 : vector<1x32xf32> to vector<16x32xf32>
    %24 = arith.addf %22, %23 : vector<16x32xf32>
    %25 = arith.truncf %24 : vector<16x32xf32> to vector<16x32xbf16>
    %c0_9 = arith.constant 0 : index
    %c0_10 = arith.constant 0 : index
    %26 = vector.load %arg3[%c0_9, %c0_10] : memref<32x96xbf16, #tpu.memory_space<vmem>>, vector<32x96xbf16>
    %cst_11 = arith.constant dense<0.000000e+00> : vector<16x96xf32>
    %27 = tpu.matmul %25, %26, %cst_11 {dimension_numbers = #tpu.dot_dimension_numbers<[1], [0], [0], [1], [0, 0, 1, 1], [], []>} : vector<16x32xbf16>, vector<32x96xbf16>, vector<16x96xf32> -> vector<16x96xf32>
    %c0_12 = arith.constant 0 : index
    %c0_13 = arith.constant 0 : index
    %28 = vector.load %arg4[%c0_12, %c0_13] : memref<1x96xf32, #tpu.memory_space<vmem>>, vector<1x96xf32>
    %29 = vector.broadcast %28 : vector<1x96xf32> to vector<16x96xf32>
    %30 = arith.addf %27, %29 : vector<16x96xf32>
    %31 = vector.extract_strided_slice %30 {offsets = [0, 0], sizes = [16, 24], strides = [1, 1]} : vector<16x96xf32> to vector<16x24xf32>
    %32 = vector.extract_strided_slice %30 {offsets = [0, 24], sizes = [16, 24], strides = [1, 1]} : vector<16x96xf32> to vector<16x24xf32>
    %33 = vector.extract_strided_slice %30 {offsets = [0, 48], sizes = [16, 24], strides = [1, 1]} : vector<16x96xf32> to vector<16x24xf32>
    %34 = vector.extract_strided_slice %30 {offsets = [0, 72], sizes = [16, 24], strides = [1, 1]} : vector<16x96xf32> to vector<16x24xf32>
    %35 = vector.shape_cast %31 : vector<16x24xf32> to vector<1x16x24xf32>
    %36 = vector.shape_cast %32 : vector<16x24xf32> to vector<1x16x24xf32>
    %37 = vector.shape_cast %33 : vector<16x24xf32> to vector<1x16x24xf32>
    %38 = vector.shape_cast %34 : vector<16x24xf32> to vector<1x16x24xf32>
    %39 = tpu.concatenate %35, %36, %37, %38 in 0 : vector<1x16x24xf32>, vector<1x16x24xf32>, vector<1x16x24xf32>, vector<1x16x24xf32> -> vector<4x16x24xf32>
    %40 = vector.shape_cast %39 : vector<4x16x24xf32> to vector<8x8x24xf32>
    %41 = arith.truncf %40 : vector<8x8x24xf32> to vector<8x8x24xbf16>
    %42 = vector.extract_strided_slice %41 {offsets = [0, 0, 0], sizes = [8, 8, 8], strides = [1, 1, 1]} : vector<8x8x24xbf16> to vector<8x8x8xbf16>
    %43 = vector.extract_strided_slice %41 {offsets = [0, 0, 8], sizes = [8, 8, 8], strides = [1, 1, 1]} : vector<8x8x24xbf16> to vector<8x8x8xbf16>
    %44 = vector.extract_strided_slice %41 {offsets = [0, 0, 16], sizes = [8, 8, 8], strides = [1, 1, 1]} : vector<8x8x24xbf16> to vector<8x8x8xbf16>
    "tpu.trace_start"() <{level = 10 : i32, message = "gnd,gmd->gnm"}> : () -> ()
    %cst_14 = arith.constant dense<0.000000e+00> : vector<8x8x8xf32>
    %45 = tpu.matmul %42, %43, %cst_14 {dimension_numbers = #tpu.dot_dimension_numbers<[2], [2], [1], [1], [0, 0, 0, 1, 1, 1], [0], [0]>} : vector<8x8x8xbf16>, vector<8x8x8xbf16>, vector<8x8x8xf32> -> vector<8x8x8xf32>
    "tpu.trace_stop"() : () -> ()
    %cst_15 = arith.constant dense<0xFF800000> : vector<8x8xf32>
    %46 = vector.multi_reduction <maximumf>, %45, %cst_15 [2] : vector<8x8x8xf32> to vector<8x8xf32>
    %47 = vector.shape_cast %46 : vector<8x8xf32> to vector<8x8x1xf32>
    %48 = vector.broadcast %47 : vector<8x8x1xf32> to vector<8x8x8xf32>
    %49 = arith.subf %45, %48 : vector<8x8x8xf32>
    %50 = math.exp %49 : vector<8x8x8xf32>
    %cst_16 = arith.constant dense<0.000000e+00> : vector<8x8xf32>
    %51 = vector.multi_reduction <add>, %50, %cst_16 [2] : vector<8x8x8xf32> to vector<8x8xf32>
    %52 = vector.shape_cast %51 : vector<8x8xf32> to vector<8x8x1xf32>
    %53 = tpu.reciprocal %52 {approx = true} : vector<8x8x1xf32> -> vector<8x8x1xf32>
    %54 = vector.broadcast %53 : vector<8x8x1xf32> to vector<8x8x8xf32>
    %55 = arith.mulf %50, %54 : vector<8x8x8xf32>
    %56 = arith.truncf %55 : vector<8x8x8xf32> to vector<8x8x8xbf16>
    "tpu.trace_start"() <{level = 10 : i32, message = "gnm,gmd->gnd"}> : () -> ()
    %cst_17 = arith.constant dense<0.000000e+00> : vector<8x8x8xf32>
    %57 = tpu.matmul %56, %44, %cst_17 {dimension_numbers = #tpu.dot_dimension_numbers<[2], [1], [1], [2], [0, 0, 0, 1, 1, 2], [0], [0]>} : vector<8x8x8xbf16>, vector<8x8x8xbf16>, vector<8x8x8xf32> -> vector<8x8x8xf32>
    "tpu.trace_stop"() : () -> ()
    %58 = vector.shape_cast %57 : vector<8x8x8xf32> to vector<4x16x8xf32>
    %59 = vector.extract_strided_slice %58 {offsets = [0, 0, 0], sizes = [1, 16, 8], strides = [1, 1, 1]} : vector<4x16x8xf32> to vector<1x16x8xf32>
    %60 = vector.shape_cast %59 : vector<1x16x8xf32> to vector<16x8xf32>
    %61 = vector.extract_strided_slice %58 {offsets = [1, 0, 0], sizes = [1, 16, 8], strides = [1, 1, 1]} : vector<4x16x8xf32> to vector<1x16x8xf32>
    %62 = vector.shape_cast %61 : vector<1x16x8xf32> to vector<16x8xf32>
    %63 = vector.extract_strided_slice %58 {offsets = [2, 0, 0], sizes = [1, 16, 8], strides = [1, 1, 1]} : vector<4x16x8xf32> to vector<1x16x8xf32>
    %64 = vector.shape_cast %63 : vector<1x16x8xf32> to vector<16x8xf32>
    %65 = vector.extract_strided_slice %58 {offsets = [3, 0, 0], sizes = [1, 16, 8], strides = [1, 1, 1]} : vector<4x16x8xf32> to vector<1x16x8xf32>
    %66 = vector.shape_cast %65 : vector<1x16x8xf32> to vector<16x8xf32>
    %67 = tpu.concatenate %60, %62, %64, %66 in 1 : vector<16x8xf32>, vector<16x8xf32>, vector<16x8xf32>, vector<16x8xf32> -> vector<16x32xf32>
    %68 = arith.addf %0, %67 : vector<16x32xf32>
    %c0_18 = arith.constant 0 : index
    %c0_19 = arith.constant 0 : index
    %69 = vector.load %arg5[%c0_18, %c0_19] : memref<1x32xf32, #tpu.memory_space<vmem>>, vector<1x32xf32>
    %c0_20 = arith.constant 0 : index
    %c0_21 = arith.constant 0 : index
    %70 = vector.load %arg6[%c0_20, %c0_21] : memref<1x32xf32, #tpu.memory_space<vmem>>, vector<1x32xf32>
    %cst_22 = arith.constant dense<0.000000e+00> : vector<16xf32>
    %71 = vector.multi_reduction <add>, %68, %cst_22 [1] : vector<16x32xf32> to vector<16xf32>
    %72 = vector.shape_cast %71 : vector<16xf32> to vector<16x1xf32>
    %cst_23 = arith.constant 3.200000e+01 : f32
    %73 = vector.broadcast %cst_23 : f32 to vector<16x1xf32>
    %74 = arith.divf %72, %73 : vector<16x1xf32>
    %75 = vector.broadcast %74 : vector<16x1xf32> to vector<16x32xf32>
    %76 = arith.subf %68, %75 : vector<16x32xf32>
    %77 = arith.mulf %76, %76 : vector<16x32xf32>
    %cst_24 = arith.constant dense<0.000000e+00> : vector<16xf32>
    %78 = vector.multi_reduction <add>, %77, %cst_24 [1] : vector<16x32xf32> to vector<16xf32>
    %79 = vector.shape_cast %78 : vector<16xf32> to vector<16x1xf32>
    %cst_25 = arith.constant 3.200000e+01 : f32
    %80 = vector.broadcast %cst_25 : f32 to vector<16x1xf32>
    %81 = arith.divf %79, %80 : vector<16x1xf32>
    %82 = vector.broadcast %74 : vector<16x1xf32> to vector<16x32xf32>
    %83 = arith.subf %68, %82 : vector<16x32xf32>
    %cst_26 = arith.constant 9.99999974E-6 : f32
    %84 = vector.broadcast %cst_26 : f32 to vector<16x1xf32>
    %85 = arith.addf %81, %84 : vector<16x1xf32>
    %86 = math.rsqrt %85 : vector<16x1xf32>
    %87 = vector.broadcast %86 : vector<16x1xf32> to vector<16x32xf32>
    %88 = arith.mulf %83, %87 : vector<16x32xf32>
    %89 = vector.broadcast %69 : vector<1x32xf32> to vector<16x32xf32>
    %90 = arith.mulf %88, %89 : vector<16x32xf32>
    %91 = vector.broadcast %70 : vector<1x32xf32> to vector<16x32xf32>
    %92 = arith.addf %90, %91 : vector<16x32xf32>
    %93 = arith.truncf %92 : vector<16x32xf32> to vector<16x32xbf16>
    %c0_27 = arith.constant 0 : index
    %c0_28 = arith.constant 0 : index
    %94 = vector.load %arg7[%c0_27, %c0_28] : memref<32x128xbf16, #tpu.memory_space<vmem>>, vector<32x128xbf16>
    %cst_29 = arith.constant dense<0.000000e+00> : vector<16x128xf32>
    %95 = tpu.matmul %93, %94, %cst_29 {dimension_numbers = #tpu.dot_dimension_numbers<[1], [0], [0], [1], [0, 0, 1, 1], [], []>} : vector<16x32xbf16>, vector<32x128xbf16>, vector<16x128xf32> -> vector<16x128xf32>
    %c0_30 = arith.constant 0 : index
    %c0_31 = arith.constant 0 : index
    %96 = vector.load %arg8[%c0_30, %c0_31] : memref<1x128xf32, #tpu.memory_space<vmem>>, vector<1x128xf32>
    %97 = vector.broadcast %96 : vector<1x128xf32> to vector<16x128xf32>
    %98 = arith.addf %95, %97 : vector<16x128xf32>
    %cst_32 = arith.constant 5.000000e-01 : f32
    %99 = vector.broadcast %cst_32 : f32 to vector<16x128xf32>
    %100 = arith.mulf %99, %98 : vector<16x128xf32>
    %cst_33 = arith.constant 0.707106769 : f32
    %101 = vector.broadcast %cst_33 : f32 to vector<16x128xf32>
    %102 = arith.mulf %98, %101 : vector<16x128xf32>
    %103 = math.erf %102 : vector<16x128xf32>
    %cst_34 = arith.constant 1.000000e+00 : f32
    %104 = vector.broadcast %cst_34 : f32 to vector<16x128xf32>
    %105 = arith.addf %104, %103 : vector<16x128xf32>
    %106 = arith.mulf %100, %105 : vector<16x128xf32>
    %107 = arith.truncf %106 : vector<16x128xf32> to vector<16x128xbf16>
    %c0_35 = arith.constant 0 : index
    %c0_36 = arith.constant 0 : index
    %108 = vector.load %arg9[%c0_35, %c0_36] : memref<128x32xbf16, #tpu.memory_space<vmem>>, vector<128x32xbf16>
    %cst_37 = arith.constant dense<0.000000e+00> : vector<16x32xf32>
    %109 = tpu.matmul %107, %108, %cst_37 {dimension_numbers = #tpu.dot_dimension_numbers<[1], [0], [0], [1], [0, 0, 1, 1], [], []>} : vector<16x128xbf16>, vector<128x32xbf16>, vector<16x32xf32> -> vector<16x32xf32>
    %c0_38 = arith.constant 0 : index
    %c0_39 = arith.constant 0 : index
    %110 = vector.load %arg10[%c0_38, %c0_39] : memref<1x32xf32, #tpu.memory_space<vmem>>, vector<1x32xf32>
    %111 = vector.broadcast %110 : vector<1x32xf32> to vector<16x32xf32>
    %112 = arith.addf %109, %111 : vector<16x32xf32>
    %113 = arith.addf %68, %112 : vector<16x32xf32>
    %c0_40 = arith.constant 0 : index
    %c0_41 = arith.constant 0 : index
    %114 = vector.load %arg11[%c0_40, %c0_41] : memref<16x32xf32, #tpu.memory_space<vmem>>, vector<16x32xf32>
    tpu.vector_store %arg11[%c0_40, %c0_41], %113 {strides = array<i32>} : memref<16x32xf32, #tpu.memory_space<vmem>>, vector<16x32xf32>,
    return
  }
}

</mosaic_0001>

<bundles_post_ra>
// kernel: tpu_custom_call.1
= control target key start
LH: loop header
LB: loop body
LE: loop exit
PB: predicated region body
PF: predicated region fallthrough
CT: control target
= control target key end

     0   :  { %vm44_vm0 = vcmask 261120   ;;  %s2036_s0 = inlined_call_operand.vmem [shape: f32[16,32], index: 0, kind: input, shape index: {}]   ;;  %s2037_s1 = inlined_call_operand.vmem [shape: f32[1,32], index: 1, kind: input, shape index: {}]   ;;  %s2038_s2 = inlined_call_operand.vmem [shape: f32[1,32], index: 2, kind: input, shape index: {}]   ;;  %s2039_s3 = inlined_call_operand.vmem [shape: bf16[32,96], index: 3, kind: input, shape index: {}]   ;;  %s2040_s4 = inlined_call_operand.vmem [shape: f32[1,96], index: 4, kind: input, shape index: {}]   ;;  %s2041_s5 = inlined_call_operand.vmem [shape: f32[1,32], index: 5, kind: input, shape index: {}]   ;;  %s2042_s6 = inlined_call_operand.vmem [shape: f32[1,32], index: 6, kind: input, shape index: {}]   ;;  %s2043_s7 = inlined_call_operand.vmem [shape: bf16[32,128], index: 7, kind: input, shape index: {}]   ;;  %s2044_s8 = inlined_call_operand.vmem [shape: f32[1,128], index: 8, kind: input, shape index: {}]   ;;  %s2045_s9 = inlined_call_operand.vmem [shape: bf16[128,32], index: 9, kind: input, shape index: {}]   ;;  %s2046_s10 = inlined_call_operand.vmem [shape: f32[1,32], index: 10, kind: input, shape index: {}]   ;;  %s2047_s11 = inlined_call_operand.hbm [shape: f32[16,32], index: 11, kind: output, shape index: {}]  }
   0x1   :  { %v1743_v0 = vld [vmem:[%s2036_s0] sm:$0xff]  ;;  %v1748_v1 = vld [vmem:[%s2036_s0 + $0x8] sm:$0xff] }
   0x2   :  { %v45_v2 = vsel %vm44_vm0, %v1743_v0, 0.0  ;;  %v48_v3 = vsel %vm44_vm0, %v1748_v1, 0.0 }
   0x3   :  { %46 = vadd.xlane.f32.xlu0 %v45_v2 }
   0x7   :  { %49 = vadd.xlane.f32.xlu0 %v48_v3 }
   0x8   :  { %16 = vsyncpa [#allocation3], 0  ;;  %v1590_v14 = vld [vmem:[%s2039_s3 + $0x8] sm:$0xff]   ;;  %v1668_v15 = vmov 0.0   ;;  %vm1669_vm1 = vmmov 0   ;;  %v1591_v16 = vld [vmem:[%s2039_s3] sm:$0xff]  }
   0x9   :  { %1431 = vmatprep.subr.bf16.mxu1 %v1668_v15  ;;  %1435 = vmatprep.mubr.msk.bf16.mxu1 %vm1669_vm1, %v1668_v15  ;;  %v1347_v25 = vld [vmem:[%s2037_s1] ss:$0 sm:$0xff]  ;;  %s1670_s1 = smov 80   ;;  %s1672_s29 = smov 56   ;;  %vm187_vm2 = vcmask 64512   ;;  %vm678_vm3 = vcmask 1043456  }
   0xa   :  { %1432 = vmatpush3.bf16.msra.mxu1 %v1590_v14  ;;  %1457 = vmatprep.subr.bf16.mxu0 %v1668_v15  ;;  %v1348_v29 = vld [vmem:[%s2038_s2] ss:$0 sm:$0xff]  ;;  %s1671_s2 = smov 104   ;;  %s1673_s30 = smov 120   ;;  %vm1084_vm4 = vcmask 130048   ;;  %vm1087_vm5 = vcmask 195584  }
   0xb   :  { %1433 = vmatprep.subr.bf16.mxu1 %v1668_v15  ;;  %1459 = vmatprep.mubr.msk.bf16.mxu0 %vm1669_vm1, %v1668_v15  ;;  %v1349_v35 = vld [vmem:[%s2040_s4] ss:$0 sm:$0xff]  ;;  %s1674_s4 = smov 112   ;;  %s1675_s12 = smov 8  }
   0xc   :  { %s1676_s13 = smov 16   ;;  %s1677_s14 = smov 24  }
   0xd   :  { %s1678_s15 = smov [#allocation2]  }
   0xe   :  { %1434 = vmatpush3.bf16.msra.mxu1 %v1591_v16  ;;  %s1336_s16 = sshll.u32 %s1678_s15, 4  ;;  %s1337_s16 = int_to_ptr.vmem [resolvable:$true] %s1336_s16 }
   0xf   :  { %1439 = vmatprep.subr.bf16.mxu1 %v1668_v15  ;;  %s1646_s17 = scalar_lea.vmem %s1337_s16, 256  ;;  %p1651_p1 = scmp.lt.s32.totalorder %s1337_s16, %s1337_s16 }
  0x10   :  { %p1647_p0 = scmp.ne.s32.totalorder %s1337_s16, %s1646_s17  ;;  %p1652_p2 = scmp.lt.s32.totalorder %s1646_s17, %s1646_s17 }
  0x12   :  { %p1653_p3 = por %p1652_p2, %p1651_p1 }
  0x14   :  { %p1654_p4 = pnand %p1653_p3, %p1647_p0 }
  0x8c   :  { %v47_v4 = vpop.xlane.xlu0 %46 }
  0x8d   :  { %v52_v5 = vmul.f32 0.03125, %v47_v4 }
  0x8f   :  { %v54_v6 = vsub.f32 %v1743_v0, %v52_v5 }
  0x90   :  { %v50_v7 = vpop.xlane.xlu0 %49 }
  0x91   :  { %v53_v8 = vmul.f32 0.03125, %v50_v7  ;;  %v56_v9 = vmul.f32 %v54_v6, %v54_v6 }
  0x93   :  { %v55_v10 = vsub.f32 %v1748_v1, %v53_v8  ;;  %v58_v11 = vsel %vm44_vm0, %v56_v9, 0.0 }
  0x94   :  { %59 = vadd.xlane.f32.xlu1 %v58_v11 }
  0x95   :  { %v57_v12 = vmul.f32 %v55_v10, %v55_v10 }
  0x97   :  { %v61_v13 = vsel %vm44_vm0, %v57_v12, 0.0 }
  0x98   :  { %62 = vadd.xlane.f32.xlu1 %v61_v13 }
 0x11d   :  { %v60_v17 = vpop.xlane.xlu1 %59 }
 0x11e   :  { %v64_v18 = vmul.f32 0.03125, %v60_v17 }
 0x120   :  { %v66_v19 = vadd.f32 1e-05, %v64_v18 }
 0x121   :  { %v63_v20 = vpop.xlane.xlu1 %62 }
 0x122   :  { %1602 = vrsqrt.f32 %v66_v19  ;;  %v65_v21 = vmul.f32 0.03125, %v63_v20 }
 0x124   :  { %v67_v22 = vadd.f32 1e-05, %v65_v21 }
 0x126   :  { %1604 = vrsqrt.f32 %v67_v22 }
 0x12f   :  { %v1603_v23 = vpop.eup %1602 }
 0x130   :  { %v70_v24 = vmul.f32 %v1603_v23, %v54_v6 }
 0x132   :  { %v78_v28 = vmul.f32 %v1347_v25, %v70_v24 }
 0x133   :  { %v1605_v26 = vpop.eup %1604 }
 0x134   :  { %v71_v27 = vmul.f32 %v1605_v26, %v55_v10  ;;  %v86_v31 = vadd.f32 %v1348_v29, %v78_v28 }
 0x136   :  { %v79_v30 = vmul.f32 %v1347_v25, %v71_v27 }
 0x138   :  { %v87_v32 = vadd.f32 %v1348_v29, %v79_v30 }
 0x13a   :  { %v88_v33 = vpack.c.bf16 %v87_v32, %v86_v31 }
 0x13c   :  { %1436 = vmatmul.mubr.msk.bf16.vlgmr.msra.gmra.mxu1 %vm44_vm0, %v88_v33 }
 0x13d   :  { %1441 = vmatprep.mubr.msk.bf16.mxu1 %vm1669_vm1, %v1668_v15 }
 0x1fc   :  { %v149_v34 = vpop.f32.mrf.mxu1 }
 0x1fd   :  { %v150_v38 = vadd.f32 %v1349_v35, %v149_v34 }
 0x1fe   :  { %v1437_v36 = vpop.f32.mrf.mxu1 }
 0x1ff   :  { %v176_v43 = vpack.c.bf16 %v150_v38, %v150_v38 }
 0x200   :  { %v152_v37 = vpop.f32.mrf.mxu1 }
 0x201   :  { %v153_v39 = vadd.f32 %v1349_v35, %v152_v37 }
 0x202   :  { %v1438_v40 = vpop.f32.mrf.mxu1 }
 0x203   :  { %v1580_v41 = vpack.i.bf16 %v153_v39, %v150_v38  ;;  %v1784_v42 = vpack.c.bf16 %v153_v39, %v153_v39 }
 0x205   :  { %1581 = vrot.lane.b32.xlu1 %v1580_v41, %s1670_s1  ;;  %1576 = vrot.lane.b32.xlu0 %v1580_v41, %s1671_s2 }
 0x209   :  { %1586 = vrot.lane.b32.xlu1 %v1580_v41, %s1672_s29  ;;  %235 = vrot.lane.b32.xlu0 %v1784_v42, %s1673_s30 }
 0x20d   :  { %185 = vrot.lane.b32.xlu1 %v176_v43, %s1673_s30 }
 0x277   :  { %v1582_v44 = vpop.permute.xlu1 %1581  ;;  %v1577_v45 = vpop.permute.xlu0 %1576 }
 0x278   :  { %v1579_v46 = vunpack.i.h.bf16 %v1577_v45  ;;  %v1578_v47 = vunpack.i.l.bf16 %v1577_v45  ;;  %v1584_v48 = vunpack.i.h.bf16 %v1582_v44  ;;  %v1583_v49 = vunpack.i.l.bf16 %v1582_v44 }
 0x27a   :  { %v1787_v50 = vpack.c.bf16 %v1579_v46, %v1579_v46  ;;  %v1789_v51 = vpack.c.bf16 %v1578_v47, %v1578_v47  ;;  %v1793_v53 = vpack.c.bf16 %v1584_v48, %v1584_v48  ;;  %v1795_v54 = vpack.c.bf16 %v1583_v49, %v1583_v49 }
 0x27b   :  { %v1587_v52 = vpop.permute.xlu1 %1586  ;;  %v236_v61 = vpop.permute.xlu0 %235 }
 0x27c   :  { %284 = vrot.lane.b32.xlu1 %v1789_v51, %s1673_s30  ;;  %333 = vrot.lane.b32.xlu0 %v1787_v50, %s1673_s30  ;;  %v1589_v55 = vunpack.i.h.bf16 %v1587_v52  ;;  %v1588_v56 = vunpack.i.l.bf16 %v1587_v52  ;;  %v241_v62 = vsel %vm187_vm2, %v236_v61, 0 }
 0x27e   :  { %v1800_v59 = vpack.c.bf16 %v1589_v55, %v1589_v55  ;;  %v1802_v60 = vpack.c.bf16 %v1588_v56, %v1588_v56 }
 0x27f   :  { %v186_v57 = vpop.permute.xlu1 %185 }
 0x280   :  { %v192_v58 = vsel %vm187_vm2, %v186_v57, 0  ;;  %382 = vrot.lane.b32.xlu1 %v1795_v54, %s1673_s30  ;;  %431 = vrot.lane.b32.xlu0 %v1793_v53, %s1673_s30 }
 0x281   :  { %1440 = vmatpush3.bf16.xpose.msra.mxu1 %v192_v58 }
 0x282   :  { %1445 = vmatprep.subr.bf16.mxu1 %v1668_v15 }
 0x284   :  { %480 = vrot.lane.b32.xlu1 %v1802_v60, %s1673_s30  ;;  %529 = vrot.lane.b32.xlu0 %v1800_v59, %s1673_s30 }
 0x288   :  { %1442 = vmatmul.mubr.msk.bf16.vlgmr.msra.gmra.mxu1 %vm187_vm2, %v176_v43  ;;  %673 = vrot.lane.b32.xlu1 %v176_v43, %s1674_s4 }
 0x289   :  { %1446 = vmatpush3.bf16.xpose.msra.mxu1 %v241_v62  ;;  %1447 = vmatprep.mubr.msk.bf16.mxu1 %vm1669_vm1, %v1668_v15 }
 0x28a   :  { %1451 = vmatprep.subr.bf16.mxu1 %v1668_v15 }
 0x290   :  { %1448 = vmatmul.mubr.msk.bf16.vlgmr.msra.gmra.mxu1 %vm187_vm2, %v1784_v42 }
 0x291   :  { %1453 = vmatprep.mubr.msk.bf16.mxu1 %vm1669_vm1, %v1668_v15 }
 0x2ee   :  { %v285_v63 = vpop.permute.xlu1 %284  ;;  %v334_v2 = vpop.permute.xlu0 %333 }
 0x2ef   :  { %v290_v3 = vsel %vm187_vm2, %v285_v63, 0  ;;  %v339_v4 = vsel %vm187_vm2, %v334_v2, 0 }
 0x2f0   :  { %1452 = vmatpush3.bf16.xpose.msra.mxu1 %v290_v3  ;;  %1458 = vmatpush3.bf16.xpose.msra.mxu0 %v339_v4 }
 0x2f1   :  { %1463 = vmatprep.subr.bf16.mxu1 %v1668_v15  ;;  %1469 = vmatprep.subr.bf16.mxu0 %v1668_v15 }
 0x2f2   :  { %v383_v5 = vpop.permute.xlu1 %382  ;;  %v432_v6 = vpop.permute.xlu0 %431 }
 0x2f3   :  { %v388_v7 = vsel %vm187_vm2, %v383_v5, 0  ;;  %v437_v8 = vsel %vm187_vm2, %v432_v6, 0 }
 0x2f6   :  { %v481_v9 = vpop.permute.xlu1 %480  ;;  %v530_v10 = vpop.permute.xlu0 %529 }
 0x2f7   :  { %1454 = vmatmul.mubr.msk.bf16.vlgmr.msra.gmra.mxu1 %vm187_vm2, %v1789_v51  ;;  %1460 = vmatmul.mubr.msk.bf16.vlgmr.msra.gmra.mxu0 %vm187_vm2, %v1787_v50  ;;  %v486_v11 = vsel %vm187_vm2, %v481_v9, 0  ;;  %v535_v12 = vsel %vm187_vm2, %v530_v10, 0 }
 0x2f8   :  { %1464 = vmatpush3.bf16.xpose.msra.mxu1 %v388_v7  ;;  %1470 = vmatpush3.bf16.xpose.msra.mxu0 %v437_v8 }
 0x2f9   :  { %1465 = vmatprep.mubr.msk.bf16.mxu1 %vm1669_vm1, %v1668_v15  ;;  %1471 = vmatprep.mubr.msk.bf16.mxu0 %vm1669_vm1, %v1668_v15 }
 0x2fa   :  { %1475 = vmatprep.subr.bf16.mxu1 %v1668_v15  ;;  %1481 = vmatprep.subr.bf16.mxu0 %v1668_v15  ;;  %v674_v13 = vpop.permute.xlu1 %673 }
 0x2fb   :  { %v680_v14 = vsel %vm678_vm3, %v674_v13, 0 }
 0x2ff   :  { %1466 = vmatmul.mubr.msk.bf16.vlgmr.msra.gmra.mxu1 %vm187_vm2, %v1795_v54  ;;  %1472 = vmatmul.mubr.msk.bf16.vlgmr.msra.gmra.mxu0 %vm187_vm2, %v1793_v53 }
 0x300   :  { %1476 = vmatpush3.bf16.xpose.msra.mxu1 %v486_v11  ;;  %1482 = vmatpush3.bf16.xpose.msra.mxu0 %v535_v12 }
 0x301   :  { %1477 = vmatprep.mubr.msk.bf16.mxu1 %vm1669_vm1, %v1668_v15  ;;  %1483 = vmatprep.mubr.msk.bf16.mxu0 %vm1669_vm1, %v1668_v15 }
 0x302   :  { %1487 = vmatprep.subr.bf16.mxu1 %v1668_v15  ;;  %1493 = vmatprep.subr.bf16.mxu0 %v1668_v15 }
 0x307   :  { %1478 = vmatmul.mubr.msk.bf16.vlgmr.msra.gmra.mxu1 %vm187_vm2, %v1802_v60  ;;  %1484 = vmatmul.mubr.msk.bf16.vlgmr.msra.gmra.mxu0 %vm187_vm2, %v1800_v59 }
 0x308   :  { %1488 = vmatpush3.bf16.msra.mxu1 %v680_v14  ;;  %1495 = vmatprep.mubr.msk.bf16.mxu0 %vm1669_vm1, %v1668_v15 }
 0x309   :  { %1489 = vmatprep.mubr.msk.bf16.mxu1 %vm1669_vm1, %v1668_v15  ;;  %1499 = vmatprep.subr.bf16.mxu1 %v1668_v15 }
 0x348   :  { %v228_v16 = vpop.f32.mrf.mxu1 }
 0x349   :  { %v577_v17 = vsel %vm187_vm2, %v228_v16, -inf }
 0x34a   :  { %578 = vmax.xlane.f32.xlu1 %v577_v17  ;;  %v1443_v18 = vpop.f32.mrf.mxu1 }
 0x34c   :  { %v231_v19 = vpop.f32.mrf.mxu1 }
 0x34e   :  { %v1444_v20 = vpop.f32.mrf.mxu1 }
 0x350   :  { %v277_v21 = vpop.f32.mrf.mxu1 }
 0x351   :  { %v580_v22 = vsel %vm187_vm2, %v277_v21, -inf }
 0x352   :  { %581 = vmax.xlane.f32.xlu0 %v580_v22  ;;  %v1449_v23 = vpop.f32.mrf.mxu1 }
 0x354   :  { %v280_v24 = vpop.f32.mrf.mxu1 }
 0x356   :  { %v1450_v25 = vpop.f32.mrf.mxu1 }
 0x3b7   :  { %v326_v26 = vpop.f32.mrf.mxu1  ;;  %v375_v27 = vpop.f32.mrf.mxu0 }
 0x3b8   :  { %v583_v28 = vsel %vm187_vm2, %v326_v26, -inf  ;;  %v586_v33 = vsel %vm187_vm2, %v375_v27, -inf }
 0x3b9   :  { %v1461_v29 = vpop.f32.mrf.mxu0  ;;  %584 = vmax.xlane.f32.xlu0 %v583_v28  ;;  %v1455_v30 = vpop.f32.mrf.mxu1 }
 0x3bb   :  { %v329_v31 = vpop.f32.mrf.mxu1  ;;  %v378_v32 = vpop.f32.mrf.mxu0 }
 0x3bd   :  { %v1462_v34 = vpop.f32.mrf.mxu0  ;;  %587 = vmax.xlane.f32.xlu0 %v586_v33  ;;  %v1456_v35 = vpop.f32.mrf.mxu1 }
 0x3bf   :  { %v424_v36 = vpop.f32.mrf.mxu1  ;;  %v1859_v37 = vpop.f32.mrf.mxu0 }
 0x3c0   :  { %v592_v38 = vsel %vm187_vm2, %v1859_v37, -inf  ;;  %v589_v39 = vsel %vm187_vm2, %v424_v36, -inf }
 0x3c1   :  { %v1473_v40 = vpop.f32.mrf.mxu0  ;;  %593 = vmax.xlane.f32.xlu0 %v592_v38  ;;  %590 = vmax.xlane.f32.xlu1 %v589_v39  ;;  %v1467_v41 = vpop.f32.mrf.mxu1 }
 0x3c3   :  { %v427_v43 = vpop.f32.mrf.mxu1  ;;  %v476_v44 = vpop.f32.mrf.mxu0 }
 0x3c5   :  { %v1468_v45 = vpop.f32.mrf.mxu1  ;;  %v1474_v46 = vpop.f32.mrf.mxu0 }
 0x3c7   :  { %v522_v47 = vpop.f32.mrf.mxu1  ;;  %v1864_v48 = vpop.f32.mrf.mxu0 }
 0x3c8   :  { %v598_v49 = vsel %vm187_vm2, %v1864_v48, -inf  ;;  %v595_v52 = vsel %vm187_vm2, %v522_v47, -inf }
 0x3c9   :  { %v1485_v55 = vpop.f32.mrf.mxu0  ;;  %599 = vmax.xlane.f32.xlu0 %v598_v49  ;;  %596 = vmax.xlane.f32.xlu1 %v595_v52  ;;  %v1479_v56 = vpop.f32.mrf.mxu1 }
 0x3cb   :  { %v525_v57 = vpop.f32.mrf.mxu1  ;;  %v574_v58 = vpop.f32.mrf.mxu0 }
 0x3cd   :  { %v1480_v61 = vpop.f32.mrf.mxu1  ;;  %v1486_v62 = vpop.f32.mrf.mxu0 }
 0x3d3   :  { %v579_v3 = vpop.xlane.xlu1 %578 }
 0x3d4   :  { %v601_v4 = vsub.f32 %v228_v16, %v579_v3 }
 0x3d6   :  { %v609_v6 = vmul.f32 1.442695, %v601_v4 }
 0x3da   :  { %770 = vrot.lane.b32.xlu1 %v1789_v51, %s1674_s4 }
 0x3db   :  { %v582_v63 = vpop.xlane.xlu0 %581 }
 0x3dc   :  { %v602_v2 = vsub.f32 %v277_v21, %v582_v63 }
 0x3de   :  { %818 = vrot.lane.b32.xlu1 %v1787_v50, %s1674_s4  ;;  %v611_v5 = vmul.f32 1.442695, %v602_v2 }
 0x3df   :  { %722 = vrot.lane.b32.xlu0 %v1784_v42, %s1674_s4 }
 0x3e0   :  { %1606 = vpow2.f32 %v611_v5 }
 0x3e1   :  { %1608 = vpow2.f32 %v609_v6 }
 0x3ed   :  { %v1607_v7 = vpop.eup %1606 }
 0x3ee   :  { %v628_v8 = vsel %vm187_vm2, %v1607_v7, 0.0  ;;  %v1876_v9 = vpop.eup %1608 }
 0x3ef   :  { %v625_v50 = vsel %vm187_vm2, %v1876_v9, 0.0 }
 0x3fe   :  { %629 = vadd.xlane.f32.xlu0 %v628_v8 }
 0x402   :  { %626 = vadd.xlane.f32.xlu1 %v625_v50 }
 0x413   :  { %866 = vrot.lane.b32.xlu1 %v1795_v54, %s1674_s4 }
 0x442   :  { %v585_v42 = vpop.xlane.xlu0 %584 }
 0x443   :  { %v603_v51 = vsub.f32 %v326_v26, %v585_v42 }
 0x445   :  { %v613_v10 = vmul.f32 1.442695, %v603_v51 }
 0x446   :  { %v588_v11 = vpop.xlane.xlu0 %587 }
 0x447   :  { %1610 = vpow2.f32 %v613_v10  ;;  %v604_v12 = vsub.f32 %v375_v27, %v588_v11 }
 0x449   :  { %v615_v13 = vmul.f32 1.442695, %v604_v12 }
 0x44a   :  { %v591_v14 = vpop.xlane.xlu1 %590  ;;  %v594_v18 = vpop.xlane.xlu0 %593 }
 0x44b   :  { %1612 = vpow2.f32 %v615_v13  ;;  %v605_v16 = vsub.f32 %v424_v36, %v591_v14  ;;  %v606_v32 = vsub.f32 %v1859_v37, %v594_v18 }
 0x44d   :  { %v617_v17 = vmul.f32 1.442695, %v605_v16  ;;  %v619_v33 = vmul.f32 1.442695, %v606_v32 }
 0x44f   :  { %1614 = vpow2.f32 %v617_v17 }
 0x452   :  { %v600_v19 = vpop.xlane.xlu0 %599  ;;  %v597_v20 = vpop.xlane.xlu1 %596 }
 0x453   :  { %v607_v21 = vsub.f32 %v522_v47, %v597_v20  ;;  %v608_v34 = vsub.f32 %v1864_v48, %v600_v19 }
 0x454   :  { %v1882_v22 = vpop.eup %1610 }
 0x455   :  { %v621_v23 = vmul.f32 1.442695, %v607_v21  ;;  %v631_v54 = vsel %vm187_vm2, %v1882_v22, 0.0  ;;  %v623_v35 = vmul.f32 1.442695, %v608_v34 }
 0x456   :  { %v723_v24 = vpop.permute.xlu0 %722  ;;  %632 = vadd.xlane.f32.xlu1 %v631_v54  ;;  %v771_v36 = vpop.permute.xlu1 %770 }
 0x457   :  { %v728_v25 = vsel %vm678_vm3, %v723_v24, 0  ;;  %1616 = vpow2.f32 %v621_v23  ;;  %v776_v52 = vsel %vm678_vm3, %v771_v36, 0 }
 0x458   :  { %v1887_v26 = vpop.eup %1612  ;;  %1494 = vmatpush3.bf16.msra.mxu0 %v728_v25  ;;  %1618 = vpow2.f32 %v619_v33 }
 0x459   :  { %v634_v27 = vsel %vm187_vm2, %v1887_v26, 0.0  ;;  %1505 = vmatprep.subr.bf16.mxu0 %v1668_v15  ;;  %1620 = vpow2.f32 %v623_v35 }
 0x45a   :  { %635 = vadd.xlane.f32.xlu0 %v634_v27  ;;  %v819_v38 = vpop.permute.xlu1 %818 }
 0x45b   :  { %v824_v47 = vsel %vm678_vm3, %v819_v38, 0 }
 0x45c   :  { %v1892_v28 = vpop.eup %1614 }
 0x45d   :  { %v637_v29 = vsel %vm187_vm2, %v1892_v28, 0.0 }
 0x45e   :  { %638 = vadd.xlane.f32.xlu1 %v637_v29 }
 0x464   :  { %v1896_v30 = vpop.eup %1616 }
 0x465   :  { %v643_v31 = vsel %vm187_vm2, %v1896_v30, 0.0  ;;  %v1906_v40 = vpop.eup %1618 }
 0x466   :  { %644 = vadd.xlane.f32.xlu1 %v643_v31  ;;  %v1910_v37 = vpop.eup %1620 }
 0x470   :  { %914 = vrot.lane.b32.xlu0 %v1793_v53, %s1674_s4  ;;  %v640_v53 = vsel %vm187_vm2, %v1906_v40, 0.0 }
 0x477   :  { %962 = vrot.lane.b32.xlu1 %v1802_v60, %s1674_s4  ;;  %v646_v60 = vsel %vm187_vm2, %v1910_v37, 0.0 }
 0x487   :  { %v630_v39 = vpop.xlane.xlu0 %629 }
 0x488   :  { %1622 = vrcp.f32 %v630_v39 }
 0x48b   :  { %v627_v41 = vpop.xlane.xlu1 %626 }
 0x48c   :  { %1624 = vrcp.f32 %v627_v41 }
 0x48f   :  { %641 = vadd.xlane.f32.xlu0 %v640_v53  ;;  %v867_v55 = vpop.permute.xlu1 %866 }
 0x490   :  { %v872_v4 = vsel %vm678_vm3, %v867_v55, 0 }
 0x493   :  { %647 = vadd.xlane.f32.xlu0 %v646_v60 }
 0x495   :  { %v1623_v43 = vpop.eup %1622 }
 0x496   :  { %v658_v44 = vmul.f32 %v1623_v43, %v1607_v7 }
 0x498   :  { %v666_v45 = vpack.c.bf16 %v658_v44, %v658_v44 }
 0x499   :  { %v1625_v46 = vpop.eup %1624 }
 0x49a   :  { %1496 = vmatmul.mubr.msk.bf16.vlgmr.msra.gmra.mxu0 %vm187_vm2, %v666_v45  ;;  %v657_v48 = vmul.f32 %v1625_v46, %v1876_v9 }
 0x49b   :  { %1506 = vmatpush3.bf16.msra.mxu0 %v824_v47  ;;  %1507 = vmatprep.mubr.msk.bf16.mxu0 %vm1669_vm1, %v1668_v15 }
 0x49c   :  { %v665_v49 = vpack.c.bf16 %v657_v48, %v657_v48  ;;  %1517 = vmatprep.subr.bf16.mxu0 %v1668_v15 }
 0x49e   :  { %1490 = vmatmul.mubr.msk.bf16.vlgmr.msra.gmra.mxu1 %vm187_vm2, %v665_v49 }
 0x49f   :  { %1500 = vmatpush3.bf16.msra.mxu1 %v776_v52  ;;  %1501 = vmatprep.mubr.msk.bf16.mxu1 %vm1669_vm1, %v1668_v15 }
 0x4a0   :  { %1511 = vmatprep.subr.bf16.mxu1 %v1668_v15 }
 0x4a9   :  { %1010 = vrot.lane.b32.xlu0 %v1800_v59, %s1674_s4 }
 0x4df   :  { %v633_v56 = vpop.xlane.xlu1 %632 }
 0x4e0   :  { %1626 = vrcp.f32 %v633_v56 }
 0x4e3   :  { %v636_v57 = vpop.xlane.xlu0 %635 }
 0x4e4   :  { %1628 = vrcp.f32 %v636_v57 }
 0x4e7   :  { %v639_v58 = vpop.xlane.xlu1 %638  ;;  %v915_v5 = vpop.permute.xlu0 %914 }
 0x4e8   :  { %1630 = vrcp.f32 %v639_v58  ;;  %v920_v8 = vsel %vm678_vm3, %v915_v5, 0 }
 0x4ed   :  { %v1627_v61 = vpop.eup %1626 }
 0x4ee   :  { %v659_v62 = vmul.f32 %v1627_v61, %v1882_v22 }
 0x4ef   :  { %v645_v63 = vpop.xlane.xlu1 %644 }
 0x4f0   :  { %v667_v2 = vpack.c.bf16 %v659_v62, %v659_v62  ;;  %1632 = vrcp.f32 %v645_v63 }
 0x4f1   :  { %v1629_v3 = vpop.eup %1628 }
 0x4f2   :  { %1502 = vmatmul.mubr.msk.bf16.vlgmr.msra.gmra.mxu1 %vm187_vm2, %v667_v2  ;;  %v660_v59 = vmul.f32 %v1629_v3, %v1887_v26 }
 0x4f3   :  { %1512 = vmatpush3.bf16.msra.mxu1 %v872_v4  ;;  %1513 = vmatprep.mubr.msk.bf16.mxu1 %vm1669_vm1, %v1668_v15  ;;  %v963_v50 = vpop.permute.xlu1 %962 }
 0x4f4   :  { %v668_v6 = vpack.c.bf16 %v660_v59, %v660_v59  ;;  %1523 = vmatprep.subr.bf16.mxu1 %v1668_v15  ;;  %v968_v51 = vsel %vm678_vm3, %v963_v50, 0 }
 0x4f5   :  { %v1631_v7 = vpop.eup %1630 }
 0x4f6   :  { %1508 = vmatmul.mubr.msk.bf16.vlgmr.msra.gmra.mxu0 %vm187_vm2, %v668_v6  ;;  %v661_v9 = vmul.f32 %v1631_v7, %v1892_v28 }
 0x4f7   :  { %1518 = vmatpush3.bf16.msra.mxu0 %v920_v8  ;;  %1519 = vmatprep.mubr.msk.bf16.mxu0 %vm1669_vm1, %v1668_v15 }
 0x4f8   :  { %1529 = vmatprep.subr.bf16.mxu0 %v1668_v15  ;;  %v669_v42 = vpack.c.bf16 %v661_v9, %v661_v9 }
 0x4fa   :  { %1514 = vmatmul.mubr.msk.bf16.vlgmr.msra.gmra.mxu1 %vm187_vm2, %v669_v42 }
 0x4fb   :  { %1524 = vmatpush3.bf16.msra.mxu1 %v968_v51  ;;  %1525 = vmatprep.mubr.msk.bf16.mxu1 %vm1669_vm1, %v1668_v15 }
 0x4fc   :  { %1535 = vmatprep.subr.bf16.mxu1 %v1668_v15 }
 0x4fd   :  { %v1633_v10 = vpop.eup %1632 }
 0x4fe   :  { %v663_v11 = vmul.f32 %v1633_v10, %v1896_v30 }
 0x500   :  { %v671_v12 = vpack.c.bf16 %v663_v11, %v663_v11 }
 0x502   :  { %1526 = vmatmul.mubr.msk.bf16.vlgmr.msra.gmra.mxu1 %vm187_vm2, %v671_v12 }
 0x503   :  { %1539 = vmatprep.mubr.msk.bf16.mxu1 %vm1669_vm1, %v1668_v15 }
 0x518   :  { %v642_v13 = vpop.xlane.xlu0 %641 }
 0x519   :  { %1634 = vrcp.f32 %v642_v13 }
 0x51c   :  { %v648_v14 = vpop.xlane.xlu0 %647 }
 0x51d   :  { %1636 = vrcp.f32 %v648_v14 }
 0x520   :  { %v1011_v18 = vpop.permute.xlu0 %1010 }
 0x521   :  { %v1016_v21 = vsel %vm678_vm3, %v1011_v18, 0 }
 0x526   :  { %v1635_v16 = vpop.eup %1634 }
 0x527   :  { %v662_v17 = vmul.f32 %v1635_v16, %v1906_v40 }
 0x529   :  { %v670_v19 = vpack.c.bf16 %v662_v17, %v662_v17 }
 0x52a   :  { %v1637_v20 = vpop.eup %1636 }
 0x52b   :  { %1520 = vmatmul.mubr.msk.bf16.vlgmr.msra.gmra.mxu0 %vm187_vm2, %v670_v19  ;;  %v664_v22 = vmul.f32 %v1637_v20, %v1910_v37  ;;  %v1592_v19 = vld [vmem:[%s2043_s7 + $0x8] sm:$0xff]   ;;  %v1593_v20 = vld [vmem:[%s2043_s7] sm:$0xff]  }
 0x52c   :  { %1530 = vmatpush3.bf16.msra.mxu0 %v1016_v21  ;;  %1531 = vmatprep.mubr.msk.bf16.mxu0 %vm1669_vm1, %v1668_v15  ;;  %v1594_v21 = vld [vmem:[%s2045_s9 + $0x38] sm:$0xff]  }
 0x52d   :  { %1543 = vmatprep.subr.bf16.mxu0 %v1668_v15  ;;  %v672_v23 = vpack.c.bf16 %v664_v22, %v664_v22  ;;  %1536 = vmatpush3.bf16.msra.mxu1 %v1592_v19 }
 0x52e   :  { %1537 = vmatprep.subr.bf16.mxu1 %v1668_v15 }
 0x531   :  { %1538 = vmatpush3.bf16.msra.mxu1 %v1593_v20 }
 0x533   :  { %1532 = vmatmul.mubr.msk.bf16.vlgmr.msra.gmra.mxu0 %vm187_vm2, %v672_v23 }
 0x534   :  { %1559 = vmatprep.mubr.msk.bf16.mxu0 %vm1669_vm1, %v1668_v15  ;;  %1544 = vmatpush3.bf16.msra.mxu0 %v1594_v21 }
 0x535   :  { %1545 = vmatprep.subr.bf16.mxu0 %v1668_v15 }
 0x55a   :  { %v764_v54 = vpop.f32.mrf.mxu0 }
 0x55c   :  { %v1497_v24 = vpop.f32.mrf.mxu0 }
 0x55e   :  { %v716_v25 = vpop.f32.mrf.mxu1  ;;  %v767_v26 = vpop.f32.mrf.mxu0 }
 0x560   :  { %v1491_v27 = vpop.f32.mrf.mxu1  ;;  %v1498_v28 = vpop.f32.mrf.mxu0 }
 0x562   :  { %v719_v29 = vpop.f32.mrf.mxu1 }
 0x563   :  { %v1369_v29 = vld [vmem:[%s2041_s5] ss:$0 sm:$0xff] }
 0x564   :  { %v1492_v30 = vpop.f32.mrf.mxu1 }
 0x5b2   :  { %v812_v31 = vpop.f32.mrf.mxu1 }
 0x5b3   :  { %1060 = vrot.lane.b32.xlu1 %v812_v31, %s1675_s12 }
 0x5b4   :  { %v1503_v32 = vpop.f32.mrf.mxu1 }
 0x5b6   :  { %v815_v33 = vpop.f32.mrf.mxu1  ;;  %v860_v34 = vpop.f32.mrf.mxu0 }
 0x5b7   :  { %1062 = vrot.lane.b32.xlu0 %v860_v34, %s1675_s12  ;;  %v1370_v33 = vld [vmem:[%s2042_s6] ss:$0 sm:$0xff] }
 0x5b8   :  { %v1504_v35 = vpop.f32.mrf.mxu1  ;;  %v1509_v36 = vpop.f32.mrf.mxu0 }
 0x5ba   :  { %v863_v38 = vpop.f32.mrf.mxu0  ;;  %v908_v39 = vpop.f32.mrf.mxu1 }
 0x5bb   :  { %1068 = vrot.lane.b32.xlu1 %v908_v39, %s1676_s13  ;;  %v1595_v39 = vld [vmem:[%s2045_s9 + $0x30] sm:$0xff]  }
 0x5bc   :  { %v1510_v40 = vpop.f32.mrf.mxu0  ;;  %v1515_v41 = vpop.f32.mrf.mxu1  ;;  %1546 = vmatpush3.bf16.msra.mxu0 %v1595_v39 }
 0x5bd   :  { %1547 = vmatprep.subr.bf16.mxu0 %v1668_v15  ;;  %v1596_v40 = vld [vmem:[%s2045_s9 + $0x28] sm:$0xff]   ;;  %v1597_v41 = vld [vmem:[%s2045_s9 + $0x20] sm:$0xff]  }
 0x5be   :  { %v911_v53 = vpop.f32.mrf.mxu1 }
 0x5bf   :  { %v1598_v53 = vld [vmem:[%s2045_s9 + $0x18] sm:$0xff]  }
 0x5c0   :  { %v1516_v37 = vpop.f32.mrf.mxu1  ;;  %1548 = vmatpush3.bf16.msra.mxu0 %v1596_v40 }
 0x5c1   :  { %1549 = vmatprep.subr.bf16.mxu0 %v1668_v15  ;;  %v1599_v37 = vld [vmem:[%s2045_s9 + $0x10] sm:$0xff]  }
 0x5c2   :  { %v1004_v60 = vpop.f32.mrf.mxu1 }
 0x5c3   :  { %1076 = vrot.lane.b32.xlu1 %v1004_v60, %s1677_s14  ;;  %v1600_v60 = vld [vmem:[%s2045_s9 + $0x8] sm:$0xff]  }
 0x5c4   :  { %v1527_v43 = vpop.f32.mrf.mxu1  ;;  %1550 = vmatpush3.bf16.msra.mxu0 %v1597_v41 }
 0x5c5   :  { %1551 = vmatprep.subr.bf16.mxu0 %v1668_v15  ;;  %v1601_v43 = vld [vmem:[%s2045_s9] sm:$0xff]  }
 0x5c6   :  { %v1007_v44 = vpop.f32.mrf.mxu1 }
 0x5c7   :  { %v1371_v44 = vld [vmem:[%s2044_s8] ss:$0 sm:$0xff] }
 0x5c8   :  { %v1528_v45 = vpop.f32.mrf.mxu1  ;;  %1552 = vmatpush3.bf16.msra.mxu0 %v1598_v53 }
 0x5c9   :  { %1553 = vmatprep.subr.bf16.mxu0 %v1668_v15 }
 0x5cc   :  { %1554 = vmatpush3.bf16.msra.mxu0 %v1599_v37 }
 0x5cd   :  { %1555 = vmatprep.subr.bf16.mxu0 %v1668_v15 }
 0x5d0   :  { %1556 = vmatpush3.bf16.msra.mxu0 %v1600_v60 }
 0x5d1   :  { %1557 = vmatprep.subr.bf16.mxu0 %v1668_v15 }
 0x5d4   :  { %1558 = vmatpush3.bf16.msra.mxu0 %v1601_v43 }
 0x5eb   :  { %v956_v46 = vpop.f32.mrf.mxu0 }
 0x5ec   :  { %1070 = vrot.lane.b32.xlu0 %v956_v46, %s1676_s13 }
 0x5ed   :  { %v1521_v47 = vpop.f32.mrf.mxu0 }
 0x5ef   :  { %v959_v48 = vpop.f32.mrf.mxu0 }
 0x5f1   :  { %v1522_v49 = vpop.f32.mrf.mxu0 }
 0x5f3   :  { %v1052_v52 = vpop.f32.mrf.mxu0 }
 0x5f4   :  { %1078 = vrot.lane.b32.xlu0 %v1052_v52, %s1677_s14 }
 0x5f5   :  { %v1533_v55 = vpop.f32.mrf.mxu0 }
 0x5f7   :  { %v1055_v56 = vpop.f32.mrf.mxu0 }
 0x5f9   :  { %v1534_v57 = vpop.f32.mrf.mxu0 }
 0x625   :  { %v1061_v58 = vpop.permute.xlu1 %1060 }
 0x626   :  { %v1082_v62 = vsel %vm187_vm2, %v716_v25, %v1061_v58 }
 0x629   :  { %v1063_v5 = vpop.permute.xlu0 %1062 }
 0x62a   :  { %v1083_v7 = vsel %vm187_vm2, %v764_v54, %v1063_v5  ;;  %v1375_v5 = vld [vmem:[%s2046_s10] ss:$0 sm:$0xff] }
 0x62d   :  { %v1069_v61 = vpop.permute.xlu1 %1068 }
 0x62e   :  { %v1085_v63 = vsel %vm1084_vm4, %v1082_v62, %v1069_v61 }
 0x635   :  { %v1077_v2 = vpop.permute.xlu1 %1076 }
 0x636   :  { %v1088_v3 = vsel %vm1087_vm5, %v1085_v63, %v1077_v2 }
 0x637   :  { %v1963_v4 = vadd.f32 %v1088_v3, %v1743_v0 }
 0x639   :  { %v1094_v59 = vsel %vm44_vm0, %v1963_v4, 0.0 }
 0x63a   :  { %1095 = vadd.xlane.f32.xlu1 %v1094_v59 }
 0x65e   :  { %v1071_v6 = vpop.permute.xlu0 %1070 }
 0x65f   :  { %v1086_v8 = vsel %vm1084_vm4, %v1083_v7, %v1071_v6 }
 0x666   :  { %v1079_v9 = vpop.permute.xlu0 %1078 }
 0x667   :  { %v1089_v50 = vsel %vm1087_vm5, %v1086_v8, %v1079_v9 }
 0x668   :  { %v1969_v42 = vadd.f32 %v1089_v50, %v1748_v1 }
 0x66a   :  { %v1097_v51 = vsel %vm44_vm0, %v1969_v42, 0.0 }
 0x66b   :  { %1098 = vadd.xlane.f32.xlu0 %v1097_v51 }
 0x6c3   :  { %v1096_v0 = vpop.xlane.xlu1 %1095 }
 0x6c4   :  { %v1100_v10 = vmul.f32 0.03125, %v1096_v0 }
 0x6c6   :  { %v1102_v11 = vsub.f32 %v1963_v4, %v1100_v10 }
 0x6c8   :  { %v1104_v12 = vmul.f32 %v1102_v11, %v1102_v11 }
 0x6ca   :  { %v1106_v13 = vsel %vm44_vm0, %v1104_v12, 0.0 }
 0x6cb   :  { %1107 = vadd.xlane.f32.xlu0 %v1106_v13 }
 0x6f4   :  { %v1099_v14 = vpop.xlane.xlu0 %1098 }
 0x6f5   :  { %v1101_v16 = vmul.f32 0.03125, %v1099_v14 }
 0x6f7   :  { %v1103_v17 = vsub.f32 %v1969_v42, %v1101_v16 }
 0x6f9   :  { %v1105_v18 = vmul.f32 %v1103_v17, %v1103_v17 }
 0x6fb   :  { %v1109_v1 = vsel %vm44_vm0, %v1105_v18, 0.0 }
 0x6fc   :  { %1110 = vadd.xlane.f32.xlu0 %v1109_v1 }
 0x754   :  { %v1108_v22 = vpop.xlane.xlu0 %1107 }
 0x755   :  { %v1112_v23 = vmul.f32 0.03125, %v1108_v22 }
 0x757   :  { %v1114_v54 = vadd.f32 1e-05, %v1112_v23 }
 0x759   :  { %1638 = vrsqrt.f32 %v1114_v54 }
 0x766   :  { %v1639_v27 = vpop.eup %1638 }
 0x767   :  { %v1118_v28 = vmul.f32 %v1639_v27, %v1102_v11 }
 0x769   :  { %v1126_v32 = vmul.f32 %v1369_v29, %v1118_v28 }
 0x76b   :  { %v1134_v35 = vadd.f32 %v1370_v33, %v1126_v32 }
 0x785   :  { %v1111_v24 = vpop.xlane.xlu0 %1110 }
 0x786   :  { %v1113_v25 = vmul.f32 0.03125, %v1111_v24 }
 0x788   :  { %v1115_v26 = vadd.f32 1e-05, %v1113_v25 }
 0x78a   :  { %1640 = vrsqrt.f32 %v1115_v26 }
 0x797   :  { %v1641_v30 = vpop.eup %1640 }
 0x798   :  { %v1119_v31 = vmul.f32 %v1641_v30, %v1103_v17 }
 0x79a   :  { %v1127_v34 = vmul.f32 %v1369_v29, %v1119_v31 }
 0x79c   :  { %v1135_v36 = vadd.f32 %v1370_v33, %v1127_v34 }
 0x79e   :  { %v1136_v38 = vpack.c.bf16 %v1135_v36, %v1134_v35 }
 0x7a0   :  { %1540 = vmatmul.mubr.msk.bf16.vlgmr.msra.gmra.mxu1 %vm44_vm0, %v1136_v38 }
 0x860   :  { %v1197_v45 = vpop.f32.mrf.mxu1 }
 0x861   :  { %v1198_v46 = vadd.f32 %v1371_v44, %v1197_v45 }
 0x862   :  { %v1541_v47 = vpop.f32.mrf.mxu1 }
 0x863   :  { %v1206_v48 = vmul.f32 0.70710677, %v1198_v46  ;;  %v1204_v61 = vmul.f32 0.5, %v1198_v46 }
 0x864   :  { %v1200_v49 = vpop.f32.mrf.mxu1 }
 0x865   :  { %1642 = verf.f32 %v1206_v48  ;;  %v1201_v52 = vadd.f32 %v1371_v44, %v1200_v49 }
 0x866   :  { %v1542_v55 = vpop.f32.mrf.mxu1 }
 0x867   :  { %v1207_v56 = vmul.f32 0.70710677, %v1201_v52  ;;  %v1205_v62 = vmul.f32 0.5, %v1201_v52 }
 0x869   :  { %1644 = verf.f32 %v1207_v56 }
 0x872   :  { %v1643_v15 = vpop.eup %1642 }
 0x873   :  { %v1210_v57 = vadd.f32 1.0, %v1643_v15 }
 0x875   :  { %v1212_v2 = vmul.f32 %v1210_v57, %v1204_v61 }
 0x876   :  { %v1645_v58 = vpop.eup %1644 }
 0x877   :  { %v1211_v63 = vadd.f32 1.0, %v1645_v58 }
 0x879   :  { %v1213_v3 = vmul.f32 %v1211_v63, %v1205_v62 }
 0x87b   :  { %v1214_v59 = vpack.c.bf16 %v1213_v3, %v1212_v2 }
 0x87d   :  { %1560 = vmatmul.mubr.bf16.vlgmr.msra.gmra.mxu0 %v1214_v59 }
 0x93d   :  { %v1320_v6 = vpop.f32.mrf.mxu0 }
 0x93e   :  { %v1321_v7 = vadd.f32 %v1375_v5, %v1320_v6 }
 0x93f   :  { %v1561_v8 = vpop.f32.mrf.mxu0 }
 0x940   :  { %v1327_v9 = vadd.f32 %v1321_v7, %v1963_v4 }
 0x941   :  { %v1323_v50 = vpop.f32.mrf.mxu0 }
 0x942   :  { %1329 = vst.msk [vmem:[#allocation2] sm:$0xff] %vm44_vm0, %v1327_v9  ;;  %v1324_v51 = vadd.f32 %v1375_v5, %v1323_v50 }
 0x943   :  { %v1562_v0 = vpop.f32.mrf.mxu0 }
 0x944   :  { %v1328_v10 = vadd.f32 %v1324_v51, %v1969_v42 }
 0x946   :  { %1330 = vst.msk [vmem:[#allocation2 + $0x8] sm:$0xff] %vm44_vm0, %v1328_v10 }
 0x947   :  { %1657 = shalt.err (!%p1654_p4)
}
 0x948   :  { %s1679_s10 = smov 128  }
 0x949   :  { %1342 = dma.vmem_to_hbm [thread:$0]  %s1337_s16, 256, %s2047_s11, [#allocation3], %s1679_s10, %s1679_s10, %s1675_s12  }
 0x94a   :  { %1666 = dma.done.wait [#allocation3], 256  }
 0x94b   :  { %1667 = vsyncadd [#allocation3], 4294967040 }
 0x94c   :  { %1346 = vsyncpa [#allocation3], 1 }

</bundles_post_ra>
